<compile_context>
chip_gen: v7x
topology: tpu7x:2x2x1
jax: 0.10.0
libtpu: 0.0.40
codegen_flags: <defaults>
</compile_context>

<pallas_src>
import math
import functools

import jax
import jax.numpy as jnp
from jax.experimental import pallas as pl
from jax.experimental.pallas import tpu as pltpu

# ---- module hyper-parameters (synthetic, deterministic) --------------------
MAX_CHAR_LEN = 64
MAX_STROKE_LEN = 128
TF_D_MODEL = 32
TF_DROPOUT = 0.1
MAX_LEN = max(MAX_CHAR_LEN, MAX_STROKE_LEN)


def build_pe_table(max_len: int = MAX_LEN, d_model: int = TF_D_MODEL) -> jnp.ndarray:
    """Sinusoidal positional-encoding table, shape (max_len, d_model), f32."""
    position = jnp.arange(0, max_len, dtype=jnp.float32)[:, None]            # (L, 1)
    div_term = jnp.exp(
        jnp.arange(0, d_model, 2, dtype=jnp.float32)
        * (-(math.log(10000.0) / d_model))
    )                                                                         # (D/2,)
    angles = position * div_term[None, :]                                     # (L, D/2)
    pe = jnp.zeros((max_len, d_model), dtype=jnp.float32)
    pe = pe.at[:, 0::2].set(jnp.sin(angles))
    pe = pe.at[:, 1::2].set(jnp.cos(angles))
    return pe


# ---- kernels ----------------------------------------------------------------
def _pe_add_kernel(x_ref, pe_ref, o_ref):
    # x_ref: (TB, S*D) lane-dense tile; pe_ref: (1, S*D) resident PE row.
    # Sublane broadcast add; unmasked, lane-dense store.
    o_ref[...] = x_ref[...] + pe_ref[...]


def _pe_add_dropout_kernel(x_ref, pe_ref, bits_ref, o_ref, *, thresh: int, scale: float):
    # Inverted dropout: keep iff raw uint32 random word >= thresh.
    # Keep prob is (2^32 - thresh)/2^32 ~= 1-p (quantization bias ~2^-32, negligible).
    y = x_ref[...] + pe_ref[...]
    keep = bits_ref[...] >= jnp.uint32(thresh)
    o_ref[...] = jnp.where(keep, y * scale, jnp.zeros_like(y))


# ---- wrapper -----------------------------------------------------------------
def _choose_row_block(B: int, row_bytes: int, target_bytes: int = 1 << 20) -> int:
    """Pick TB rows of the (B, S*D) view: ~1 MiB tiles, sublane (8) aligned."""
    tb = max(1, target_bytes // max(int(row_bytes), 1))
    if tb >= B:
        return B                      # full batch dim -> single grid step
    tb = max(8, (tb // 8) * 8)        # keep sublane extent a multiple of 8
    return min(tb, B)


def positional_encoding(x: jnp.ndarray,
                        pe_table: jnp.ndarray,
                        *,
                        training: bool = False,
                        dropout_p: float = TF_DROPOUT,
                        rng_key=None) -> jnp.ndarray:
    """x: (B, S, D). Returns x + pe[:S] (with inverted dropout iff training)."""
    B, S, D = x.shape
    F = S * D                                           # lane-dense flattened width
    x2 = x.reshape(B, F)                                # free (row-major contiguous)
    pe_flat = pe_table[:S, :].astype(x.dtype).reshape(1, F)

    itemsize = jnp.dtype(x.dtype).itemsize
    TB = _choose_row_block(B, F * itemsize)
    grid = (pl.cdiv(B, TB),)

    x_spec = pl.BlockSpec((TB, F), lambda i: (i, 0))
    pe_spec = pl.BlockSpec((1, F), lambda i: (0, 0))    # resident across the grid
    o_spec = pl.BlockSpec((TB, F), lambda i: (i, 0))
    out_shape = jax.ShapeDtypeStruct((B, F), x.dtype)

    cparams = pltpu.CompilerParams(dimension_semantics=("parallel",))

    if (not training) or dropout_p <= 0.0:
        out2 = pl.pallas_call(
            _pe_add_kernel,
            out_shape=out_shape,
            grid_spec=pltpu.PrefetchScalarGridSpec(
                num_scalar_prefetch=0,
                grid=grid,
                in_specs=[x_spec, pe_spec],
                out_specs=o_spec,
            ),
            compiler_params=cparams,
        )(x2, pe_flat)
        return out2.reshape(B, S, D)

    # Training path: draw raw uint32 randoms in the wrapper (deterministic given
    # rng_key); kernel does threshold compare + select + scale on the VPU.
    if rng_key is None:
        rng_key = jax.random.PRNGKey(0)
    bits = jax.random.bits(rng_key, (B, F), dtype=jnp.uint32)

    thresh = min(int(round(dropout_p * float(1 << 32))), (1 << 32) - 1)
    scale = 1.0 / (1.0 - dropout_p)
    kernel = functools.partial(_pe_add_dropout_kernel, thresh=thresh, scale=scale)

    out2 = pl.pallas_call(
        kernel,
        out_shape=out_shape,
        grid_spec=pltpu.PrefetchScalarGridSpec(
            num_scalar_prefetch=0,
            grid=grid,
            in_specs=[x_spec, pe_spec, x_spec],         # bits tiled like x
            out_specs=o_spec,
        ),
        compiler_params=cparams,
    )(x2, pe_flat, bits)
    return out2.reshape(B, S, D)


# ---- demo / self-check -------------------------------------------------------
if __name__ == "__main__":
    key = jax.random.PRNGKey(0)
    B, S, D = 2, 8, TF_D_MODEL
    x = jax.random.normal(key, (B, S, D), dtype=jnp.float32)

    pe_table = build_pe_table()

    # Eval-mode forward (dropout is identity), matches PyTorch module in .eval().
    out = jax.block_until_ready(positional_encoding(x, pe_table, training=False))
    ref = x + pe_table[None, :S, :]
    assert out.shape == (B, S, D) and out.dtype == jnp.float32
    assert jnp.allclose(out, ref, atol=1e-6, rtol=1e-6)

    # Training-mode forward: surviving elements equal ref / (1 - p), rest are 0.
    out_tr = jax.block_until_ready(
        positional_encoding(x, pe_table, training=True, rng_key=jax.random.PRNGKey(123)))
    kept = out_tr != 0.0   # test-only heuristic; an exactly-zero kept value would be a false positive
    assert jnp.allclose(jnp.where(kept, out_tr * (1.0 - TF_DROPOUT), 0.0),
                        jnp.where(kept, ref, 0.0), atol=1e-5, rtol=1e-5)

    print("KERNEL_OK")
</pallas_src>

<mosaic_0001>
module attributes {stable_mosaic.version = 11 : i64} {
  func.func @_pe_add_kernel(%arg0: i32, %arg1: memref<2x256xf32, #tpu.memory_space<vmem>>, %arg2: memref<1x256xf32, #tpu.memory_space<vmem>>, %arg3: memref<2x256xf32, #tpu.memory_space<vmem>>) attributes {dimension_semantics = [#tpu.dimension_semantics<parallel>], iteration_bounds = array<i64: 1>, scalar_prefetch = 0 : i64, scratch_operands = 0 : i64, tpu.core_type = #tpu.core_type<tc>, window_params = [{transform_indices = @transform_0, window_bounds = array<i64: 2, 256>}, {pipeline_mode = #tpu.pipeline_mode<synchronous>, transform_indices = @transform_1, window_bounds = array<i64: 1, 256>}, {transform_indices = @transform_2, window_bounds = array<i64: 2, 256>}]} {
    %c0 = arith.constant 0 : index
    %c0_0 = arith.constant 0 : index
    %0 = vector.load %arg1[%c0, %c0_0] : memref<2x256xf32, #tpu.memory_space<vmem>>, vector<2x256xf32>
    %c0_1 = arith.constant 0 : index
    %c0_2 = arith.constant 0 : index
    %1 = vector.load %arg2[%c0_1, %c0_2] : memref<1x256xf32, #tpu.memory_space<vmem>>, vector<1x256xf32>
    %2 = vector.broadcast %1 : vector<1x256xf32> to vector<2x256xf32>
    %3 = arith.addf %0, %2 : vector<2x256xf32>
    %c0_3 = arith.constant 0 : index
    %c0_4 = arith.constant 0 : index
    %4 = vector.load %arg3[%c0_3, %c0_4] : memref<2x256xf32, #tpu.memory_space<vmem>>, vector<2x256xf32>
    tpu.vector_store %arg3[%c0_3, %c0_4], %3 {strides = array<i32>} : memref<2x256xf32, #tpu.memory_space<vmem>>, vector<2x256xf32>,
    return
  }
  func.func @transform_0(%arg0: i32) -> (i32, i32) {
    %c0_i32 = arith.constant 0 : i32
    %c0_i32_0 = arith.constant 0 : i32
    return %arg0, %c0_i32 : i32, i32
  }
  func.func @transform_1(%arg0: i32) -> (i32, i32) {
    %c0_i32 = arith.constant 0 : i32
    %c0_i32_0 = arith.constant 0 : i32
    %c0_i32_1 = arith.constant 0 : i32
    return %c0_i32, %c0_i32_0 : i32, i32
  }
  func.func @transform_2(%arg0: i32) -> (i32, i32) {
    %c0_i32 = arith.constant 0 : i32
    %c0_i32_0 = arith.constant 0 : i32
    return %arg0, %c0_i32 : i32, i32
  }
}

</mosaic_0001>

<bundles_post_ra>
// kernel: tpu_custom_call.1
= control target key start
LH: loop header
LB: loop body
LE: loop exit
PB: predicated region body
PF: predicated region fallthrough
CT: control target
= control target key end

     0   :  { %7 = vsyncpa [#allocation3], 0  ;;  %s157_s0 = inlined_call_operand.hbm [shape: f32[2,256], index: 0, kind: input, shape index: {}]   ;;  %s158_s1 = inlined_call_operand.vmem [shape: f32[1,256], index: 1, kind: input, shape index: {}]   ;;  %s159_s2 = inlined_call_operand.hbm [shape: f32[2,256], index: 2, kind: output, shape index: {}]  }
   0x1   :  { %8 = vsyncpa [#allocation4], 0  ;;  %s112_s9 = smov [#allocation2]   ;;  %s64_s13 = scalar_lea.hbm %s157_s0, 64 }
   0x2   :  { %s15_s10 = sshll.u32 %s112_s9, 4  ;;  %p65_p0 = scmp.ne.s32.totalorder %s157_s0, %s64_s13  ;;  %s16_s10 = int_to_ptr.vmem [resolvable:$true] %s15_s10 }
   0x3   :  { %p68_p1 = scmp.lt.u32.totalorder %s64_s13, %s157_s0 }
   0x5   :  { %p70_p2 = pnand %p68_p1, %p65_p0 }
   0x7   :  { %73 = shalt.err (!%p70_p2)
}
   0x8   :  { %s74_s18 = scalar_lea.vmem %s16_s10, 64  ;;  %p79_p4 = scmp.lt.s32.totalorder %s16_s10, %s16_s10 }
   0x9   :  { %p75_p3 = scmp.ne.s32.totalorder %s16_s10, %s74_s18  ;;  %p80_p5 = scmp.lt.s32.totalorder %s74_s18, %s74_s18 }
   0xb   :  { %p81_p6 = por %p80_p5, %p79_p4 }
   0xd   :  { %p82_p7 = pnand %p81_p6, %p75_p3 }
   0xf   :  { %85 = shalt.err (!%p82_p7)
}
  0x10   :  { %18 = dma.hbm_to_vmem [thread:$0]  %s157_s0, 64, %s16_s10, [#allocation3]  }
  0x11   :  { %108 = dma.done.wait [#allocation3], 64  }
  0x12   :  { %109 = vsyncadd [#allocation3], 4294967232  ;;  %v27_v0 = vlaneseq  ;;  %v113_v1 = vmov 1983009808   ;;  %v25_v7 = vld [vmem:[%s158_s1] sm:$0x3] }
  0x13   :  { %v37_v2 = vunpack.c.l.s4 %v113_v1  ;;  %v24_v12 = vld [vmem:[#allocation2] sm:$0xf]  ;;  %s114_s23 = smov [#allocation5]  }
  0x14   :  { %v28_v3 = vshrl.u32 %v27_v0, 7  ;;  %s52_s0 = sshll.u32 %s114_s23, 4  ;;  %s53_s0 = int_to_ptr.vmem [resolvable:$true] %s52_s0 }
  0x15   :  { %v38_v6 = vunpack.c.0.s8 %v37_v2  ;;  %s86_s24 = scalar_lea.vmem %s53_s0, 64  ;;  %p91_p9 = scmp.lt.s32.totalorder %s53_s0, %s53_s0 }
  0x16   :  { %v29_v4 = vsub.s32 0, %v28_v3  ;;  %v33_v5 = vsub.s32 1, %v28_v3  ;;  %p87_p8 = scmp.ne.s32.totalorder %s53_s0, %s86_s24  ;;  %p92_p10 = scmp.lt.s32.totalorder %s86_s24, %s86_s24 }
  0x17   :  { %v41_v10 = vsub.s32 %v38_v6, %v28_v3 }
  0x18   :  { %v30_v8 = vrot.slane %v25_v7, %v29_v4  ;;  %v34_v9 = vrot.slane %v25_v7, %v33_v5  ;;  %p93_p11 = por %p92_p10, %p91_p9 }
  0x1a   :  { %v35_v11 = vcombine.low %v30_v8, %v34_v9  ;;  %p94_p12 = pnand %p93_p11, %p87_p8 }
  0x1c   :  { %v42_v13 = vrot.slane %v35_v11, %v41_v10 }
  0x1e   :  { %v44_v14 = vadd.f32 %v42_v13, %v24_v12 }
  0x20   :  { %45 = vst [vmem:[#allocation5] sm:$0xf] %v44_v14 }
  0x21   :  { %97 = shalt.err (!%p94_p12)
}
  0x22   :  { %s98_s26 = scalar_lea.hbm %s159_s2, 64 }
  0x23   :  { %p99_p13 = scmp.ne.s32.totalorder %s159_s2, %s98_s26  ;;  %p102_p0 = scmp.lt.u32.totalorder %s98_s26, %s159_s2 }
  0x25   :  { %p104_p1 = pnand %p102_p0, %p99_p13 }
  0x27   :  { %107 = shalt.err (!%p104_p1)
}
  0x28   :  { %55 = dma.vmem_to_hbm [thread:$0]  %s53_s0, 64, %s159_s2, [#allocation4]  }
  0x29   :  { %110 = dma.done.wait [#allocation4], 64  }
  0x2a   :  { %111 = vsyncadd [#allocation4], 4294967232 }
  0x2b   :  { %59 = vsyncpa [#allocation3], 1 }
  0x2c   :  { %60 = vsyncpa [#allocation4], 1 }

</bundles_post_ra>
